<compile_context>
chip_gen: v7x
topology: tpu7x:2x2x1
jax: 0.10.0
libtpu: 0.0.40
codegen_flags: <defaults>
</compile_context>

<pallas_src>
import functools
import math

import numpy as np
import jax
import jax.numpy as jnp
from jax.experimental import pallas as pl
from jax.experimental.pallas import tpu as pltpu


# ------------------------------- Pallas kernel -------------------------------


def _equal_linear_kernel(scale, activate, neg_slope, act_gain,
                         x_ref, w_ref, b_ref, o_ref):
    """Fused EqualLinear tile.

    x_ref: (tm, tk) bf16 input tile
    w_ref: (tn, tk) bf16 weight tile (natural (out_ch, in_ch) layout)
    b_ref: (1,  tn) f32 bias tile (already scaled by lr_mul)
    o_ref: (tm, tn) f32 output tile; doubles as the K-axis accumulator.
    """
    k = pl.program_id(2)

    @pl.when(k == 0)
    def _():
        o_ref[...] = jnp.zeros_like(o_ref)

    # A @ B^T on the MXU: contract last dim of x with last dim of w, f32 acc.
    o_ref[...] += jax.lax.dot_general(
        x_ref[...], w_ref[...],
        dimension_numbers=(((1,), (1,)), ((), ())),
        preferred_element_type=jnp.float32)

    @pl.when(k == pl.num_programs(2) - 1)
    def _():
        # out = x @ (scale * W).T + lr_mul * bias   (scale folded into epilogue)
        out = o_ref[...] * scale + b_ref[...]
        if activate:  # FusedLeakyReLU: leaky_relu(out + b, 0.2) * sqrt(2)
            out = jnp.where(out >= 0.0, out, neg_slope * out) * act_gain
        o_ref[...] = out


# -------------------------------- wrapper glue --------------------------------


def _round_up(x, m):
    return ((x + m - 1) // m) * m


def _cdiv(a, b):
    return (a + b - 1) // b


def _vmem_limit_bytes():
    # Generation-gated cap: ~3/4 of physical VMEM (v5e/v6e 128 MiB -> 96 MiB,
    # v7x 64 MiB -> 48 MiB).  Fall back to a v7x-safe 48 MiB if the query fails.
    try:
        cap = pltpu.get_tpu_info().vmem_capacity_bytes
        return int(min(cap * 3 // 4, 100 * 1024 * 1024))
    except Exception:
        return 48 * 1024 * 1024


def equal_linear(x, weight, bias=None, *, lr_mul=1.0, activate=False,
                 tm=512, tn=512, tk=1024):
    """Forward pass of EqualLinear.

    x:      (..., in_channel)
    weight: (out_channel, in_channel)
    bias:   (out_channel,) or None
    """
    out_ch, in_ch = weight.shape
    lead = x.shape[:-1]
    x2 = x.reshape(-1, in_ch)
    M, K = x2.shape
    N = out_ch

    scale = 1.0 / math.sqrt(in_ch) * lr_mul

    # Tile sizes: MXU/lane aligned, clipped to (padded) problem size.
    tm = min(tm, _round_up(M, 8))
    tn = min(tn, _round_up(N, 128))
    tk = min(tk, _round_up(K, 128))
    # v7x megacore: if the M axis has a single block, keep >= 2 blocks on the
    # parallel N axis (when N allows) so both TensorCores get work.
    if _cdiv(M, tm) == 1:
        while tn > 128 and _cdiv(_round_up(N, 128), tn) < 2:
            tn = max(128, _round_up(tn // 2, 128))

    Mp, Np, Kp = _round_up(M, tm), _round_up(N, tn), _round_up(K, tk)

    # bf16 operands (f32 accumulation in-kernel).  Only pad when actually
    # unaligned; the K tail MUST be zero-padded so it contributes 0 to the dot.
    x_p = x2.astype(jnp.bfloat16)
    if (Mp, Kp) != (M, K):
        x_p = jnp.pad(x_p, ((0, Mp - M), (0, Kp - K)))
    w_p = weight.astype(jnp.bfloat16)
    if (Np, Kp) != (N, K):
        w_p = jnp.pad(w_p, ((0, Np - N), (0, Kp - K)))

    b = (jnp.zeros((N,), jnp.float32) if bias is None
         else bias.astype(jnp.float32) * lr_mul)       # bias pre-scaled by lr_mul
    if Np != N:
        b = jnp.pad(b, (0, Np - N))
    b_p = b.reshape(1, Np)

    grid = (Mp // tm, Np // tn, Kp // tk)

    out = pl.pallas_call(
        functools.partial(_equal_linear_kernel, scale, bool(activate),
                          0.2, math.sqrt(2.0)),
        grid_spec=pltpu.PrefetchScalarGridSpec(
            num_scalar_prefetch=0,
            grid=grid,
            in_specs=[
                pl.BlockSpec((tm, tk), lambda i, j, k: (i, k)),   # x
                pl.BlockSpec((tn, tk), lambda i, j, k: (j, k)),   # W (natural layout)
                pl.BlockSpec((1, tn), lambda i, j, k: (0, j)),    # bias
            ],
            out_specs=pl.BlockSpec((tm, tn), lambda i, j, k: (i, j)),
        ),
        out_shape=jax.ShapeDtypeStruct((Mp, Np), jnp.float32),
        compiler_params=pltpu.CompilerParams(
            dimension_semantics=("parallel", "parallel", "arbitrary"),
            vmem_limit_bytes=_vmem_limit_bytes(),
        ),
    )(x_p, w_p, b_p)

    out = out[:M, :N]
    return out.reshape(*lead, N).astype(x.dtype)


# ------------------------------ pure-JAX reference ----------------------------


def reference(x, weight, bias=None, *, lr_mul=1.0, activate=False):
    out_ch, in_ch = weight.shape
    scale = 1.0 / math.sqrt(in_ch) * lr_mul
    out = jnp.matmul(x, (weight * scale).T, precision=jax.lax.Precision.HIGHEST)
    b = jnp.zeros((out_ch,), jnp.float32) if bias is None else bias
    out = out + b * lr_mul
    if activate:
        out = jnp.where(out >= 0.0, out, 0.2 * out) * math.sqrt(2.0)
    return out


# ------------------------------------ main ------------------------------------


if __name__ == "__main__":
    # Small shapes consistent with EqualLinear usage: (batch, seq, in_channel).
    B, S, in_ch, out_ch = 2, 8, 32, 64

    key = jax.random.PRNGKey(0)
    kx, kw, kb = jax.random.split(key, 3)

    x = jax.random.normal(kx, (B, S, in_ch), dtype=jnp.float32)
    weight = jax.random.normal(kw, (out_ch, in_ch), dtype=jnp.float32)
    bias = jax.random.normal(kb, (out_ch,), dtype=jnp.float32) * 0.1

    # Jitted entry points so the wrapper cast/pad/slice glue fuses (perf review).
    eqlin_plain = jax.jit(functools.partial(equal_linear, lr_mul=1.0, activate=False))
    eqlin_act = jax.jit(functools.partial(equal_linear, lr_mul=1.0, activate=True))

    # activate=False branch (module default): F.linear(x, W*scale, bias*lr_mul)
    out_plain = jax.block_until_ready(eqlin_plain(x, weight, bias))
    # activate=True branch: F.linear(x, W*scale) -> fused_leaky_relu(., bias*lr_mul)
    out_act = jax.block_until_ready(eqlin_act(x, weight, bias))

    # Kernel uses bf16 operands with f32 accumulation; compare against a
    # reference computed with the same bf16-rounded operands in f32 math.
    x_r = x.astype(jnp.bfloat16).astype(jnp.float32)
    w_r = weight.astype(jnp.bfloat16).astype(jnp.float32)
    ref_plain = jax.block_until_ready(
        reference(x_r, w_r, bias, lr_mul=1.0, activate=False))
    ref_act = jax.block_until_ready(
        reference(x_r, w_r, bias, lr_mul=1.0, activate=True))

    np.testing.assert_allclose(np.asarray(out_plain), np.asarray(ref_plain),
                               rtol=1e-3, atol=1e-3)
    np.testing.assert_allclose(np.asarray(out_act), np.asarray(ref_act),
                               rtol=1e-3, atol=1e-3)
    print("KERNEL_OK")
</pallas_src>

<mosaic_0001>
module attributes {stable_mosaic.version = 11 : i64} {
  func.func @_equal_linear_kernel(%arg0: i32, %arg1: i32, %arg2: i32, %arg3: memref<16x128xbf16, #tpu.memory_space<vmem>>, %arg4: memref<128x128xbf16, #tpu.memory_space<vmem>>, %arg5: memref<1x128xf32, #tpu.memory_space<vmem>>, %arg6: memref<16x128xf32, #tpu.memory_space<vmem>>) attributes {dimension_semantics = [#tpu.dimension_semantics<parallel>, #tpu.dimension_semantics<parallel>, #tpu.dimension_semantics<arbitrary>], iteration_bounds = array<i64: 1, 1, 1>, scalar_prefetch = 0 : i64, scratch_operands = 0 : i64, tpu.core_type = #tpu.core_type<tc>, window_params = [{transform_indices = @transform_0, window_bounds = array<i64: 16, 128>}, {transform_indices = @transform_1, window_bounds = array<i64: 128, 128>}, {transform_indices = @transform_2, window_bounds = array<i64: 1, 128>}, {transform_indices = @transform_3, window_bounds = array<i64: 16, 128>}]} {
    %c0_i32 = arith.constant 0 : i32
    %0 = arith.cmpi eq, %arg2, %c0_i32 : i32
    %1 = arith.extui %0 : i1 to i32
    %c0_i32_0 = arith.constant 0 : i32
    %2 = arith.cmpi ne, %1, %c0_i32_0 : i32
    scf.if %2 {
      %cst_10 = arith.constant 0.000000e+00 : f32
      %12 = vector.broadcast %cst_10 : f32 to vector<16x128xf32>
      %c0_11 = arith.constant 0 : index
      %c0_12 = arith.constant 0 : index
      %13 = vector.load %arg6[%c0_11, %c0_12] : memref<16x128xf32, #tpu.memory_space<vmem>>, vector<16x128xf32>
      tpu.vector_store %arg6[%c0_11, %c0_12], %12 {strides = array<i32>} : memref<16x128xf32, #tpu.memory_space<vmem>>, vector<16x128xf32>,
    } else {
    }
    %c0 = arith.constant 0 : index
    %c0_1 = arith.constant 0 : index
    %3 = vector.load %arg6[%c0, %c0_1] : memref<16x128xf32, #tpu.memory_space<vmem>>, vector<16x128xf32>
    %c0_2 = arith.constant 0 : index
    %c0_3 = arith.constant 0 : index
    %4 = vector.load %arg3[%c0_2, %c0_3] : memref<16x128xbf16, #tpu.memory_space<vmem>>, vector<16x128xbf16>
    %c0_4 = arith.constant 0 : index
    %c0_5 = arith.constant 0 : index
    %5 = vector.load %arg4[%c0_4, %c0_5] : memref<128x128xbf16, #tpu.memory_space<vmem>>, vector<128x128xbf16>
    %cst = arith.constant dense<0.000000e+00> : vector<16x128xf32>
    %6 = tpu.matmul %4, %5, %cst {dimension_numbers = #tpu.dot_dimension_numbers<[1], [1], [0], [0], [0, 0, 1, 0], [], []>} : vector<16x128xbf16>, vector<128x128xbf16>, vector<16x128xf32> -> vector<16x128xf32>
    %7 = arith.addf %3, %6 : vector<16x128xf32>
    %c0_6 = arith.constant 0 : index
    %c0_7 = arith.constant 0 : index
    %8 = vector.load %arg6[%c0_6, %c0_7] : memref<16x128xf32, #tpu.memory_space<vmem>>, vector<16x128xf32>
    tpu.vector_store %arg6[%c0_6, %c0_7], %7 {strides = array<i32>} : memref<16x128xf32, #tpu.memory_space<vmem>>, vector<16x128xf32>,
    %c0_i32_8 = arith.constant 0 : i32
    %9 = arith.cmpi eq, %arg2, %c0_i32_8 : i32
    %10 = arith.extui %9 : i1 to i32
    %c0_i32_9 = arith.constant 0 : i32
    %11 = arith.cmpi ne, %10, %c0_i32_9 : i32
    scf.if %11 {
      %c0_10 = arith.constant 0 : index
      %c0_11 = arith.constant 0 : index
      %12 = vector.load %arg6[%c0_10, %c0_11] : memref<16x128xf32, #tpu.memory_space<vmem>>, vector<16x128xf32>
      %cst_12 = arith.constant 0.176776692 : f32
      %13 = vector.broadcast %cst_12 : f32 to vector<16x128xf32>
      %14 = arith.mulf %12, %13 : vector<16x128xf32>
      %c0_13 = arith.constant 0 : index
      %c0_14 = arith.constant 0 : index
      %15 = vector.load %arg5[%c0_13, %c0_14] : memref<1x128xf32, #tpu.memory_space<vmem>>, vector<1x128xf32>
      %16 = vector.broadcast %15 : vector<1x128xf32> to vector<16x128xf32>
      %17 = arith.addf %14, %16 : vector<16x128xf32>
      %c0_15 = arith.constant 0 : index
      %c0_16 = arith.constant 0 : index
      %18 = vector.load %arg6[%c0_15, %c0_16] : memref<16x128xf32, #tpu.memory_space<vmem>>, vector<16x128xf32>
      tpu.vector_store %arg6[%c0_15, %c0_16], %17 {strides = array<i32>} : memref<16x128xf32, #tpu.memory_space<vmem>>, vector<16x128xf32>,
    } else {
    }
    return
  }
  func.func @transform_0(%arg0: i32, %arg1: i32, %arg2: i32) -> (i32, i32) {
    %c0_i32 = arith.constant 0 : i32
    return %arg0, %arg2 : i32, i32
  }
  func.func @transform_1(%arg0: i32, %arg1: i32, %arg2: i32) -> (i32, i32) {
    %c0_i32 = arith.constant 0 : i32
    return %arg1, %arg2 : i32, i32
  }
  func.func @transform_2(%arg0: i32, %arg1: i32, %arg2: i32) -> (i32, i32) {
    %c0_i32 = arith.constant 0 : i32
    %c0_i32_0 = arith.constant 0 : i32
    return %c0_i32, %arg1 : i32, i32
  }
  func.func @transform_3(%arg0: i32, %arg1: i32, %arg2: i32) -> (i32, i32) {
    %c0_i32 = arith.constant 0 : i32
    return %arg0, %arg1 : i32, i32
  }
}

</mosaic_0001>

<bundles_post_ra>
// kernel: equal_linear.1
= control target key start
LH: loop header
LB: loop body
LE: loop exit
PB: predicated region body
PF: predicated region fallthrough
CT: control target
= control target key end

     0   :  { %v212_v0 = vmov 0.0   ;;  %vm213_vm0 = vmmov 0   ;;  %s270_s1 = inlined_call_operand.vmem [shape: bf16[128,128], index: 1, kind: input, shape index: {}]   ;;  %s271_s0 = inlined_call_operand.vmem [shape: bf16[16,128], index: 0, kind: input, shape index: {}]   ;;  %s272_s2 = inlined_call_operand.vmem [shape: f32[1,128], index: 2, kind: input, shape index: {}]   ;;  %s273_s3 = inlined_call_operand.vmem [shape: f32[16,128], index: 3, kind: output, shape index: {}]  }
   0x1   :  { %181 = vmatprep.subr.bf16.mxu0 %v212_v0  ;;  %v203_v1 = vld [vmem:[%s270_s1] sm:$0xff]   ;;  %197 = vmatprep.mubr.msk.bf16.mxu0 %vm213_vm0, %v212_v0  ;;  %v204_v2 = vld [vmem:[%s270_s1 + $0x8] sm:$0xff]   ;;  %v205_v3 = vld [vmem:[%s270_s1 + $0x10] sm:$0xff]  }
   0x2   :  { %182 = vmatpush3.bf16.xpose.msra.mxu0 %v203_v1  ;;  %v206_v4 = vld [vmem:[%s270_s1 + $0x18] sm:$0xff]   ;;  %v207_v5 = vld [vmem:[%s270_s1 + $0x20] sm:$0xff]   ;;  %v208_v6 = vld [vmem:[%s270_s1 + $0x28] sm:$0xff]  }
   0x3   :  { %183 = vmatprep.subr.bf16.mxu0 %v212_v0  ;;  %v209_v7 = vld [vmem:[%s270_s1 + $0x30] sm:$0xff]   ;;  %v210_v8 = vld [vmem:[%s270_s1 + $0x38] sm:$0xff]   ;;  %v211_v9 = vld [vmem:[%s271_s0] sm:$0xff]  }
   0x4   :  { %v171_v12 = vld [vmem:[%s272_s2] ss:$0 sm:$0xff] }
   0xa   :  { %184 = vmatpush3.bf16.xpose.msra.mxu0 %v204_v2 }
   0xb   :  { %185 = vmatprep.subr.bf16.mxu0 %v212_v0 }
  0x12   :  { %186 = vmatpush3.bf16.xpose.msra.mxu0 %v205_v3 }
  0x13   :  { %187 = vmatprep.subr.bf16.mxu0 %v212_v0 }
  0x1a   :  { %188 = vmatpush3.bf16.xpose.msra.mxu0 %v206_v4 }
  0x1b   :  { %189 = vmatprep.subr.bf16.mxu0 %v212_v0 }
  0x22   :  { %190 = vmatpush3.bf16.xpose.msra.mxu0 %v207_v5 }
  0x23   :  { %191 = vmatprep.subr.bf16.mxu0 %v212_v0 }
  0x2a   :  { %192 = vmatpush3.bf16.xpose.msra.mxu0 %v208_v6 }
  0x2b   :  { %193 = vmatprep.subr.bf16.mxu0 %v212_v0 }
  0x32   :  { %194 = vmatpush3.bf16.xpose.msra.mxu0 %v209_v7 }
  0x33   :  { %195 = vmatprep.subr.bf16.mxu0 %v212_v0 }
  0x3a   :  { %196 = vmatpush3.bf16.xpose.msra.mxu0 %v210_v8 }
  0x41   :  { %198 = vmatmul.mubr.bf16.vlgmr.msra.gmra.mrb[0].mxu0 %v211_v9 }
 0x114   :  { %v129_v10 = vpop.f32.mrb[0].mxu0 }
 0x115   :  { %v199_v11 = vpop.f32.mrb[1].mxu0  ;;  %v145_v14 = vmul.f32 0.17677669, %v129_v10 }
 0x116   :  { %v132_v13 = vpop.f32.mrb[2].mxu0 }
 0x117   :  { %v200_v15 = vpop.f32.mrb[3].mxu0  ;;  %v154_v16 = vadd.f32 %v171_v12, %v145_v14  ;;  %v146_v17 = vmul.f32 0.17677669, %v132_v13 }
 0x119   :  { %156 = vst [vmem:[%s273_s3] sm:$0xff] %v154_v16  ;;  %v155_v18 = vadd.f32 %v171_v12, %v146_v17 }
 0x11b   :  { %157 = vst [vmem:[%s273_s3 + $0x8] sm:$0xff] %v155_v18 }

</bundles_post_ra>
